<compile_context>
chip_gen: v6e
topology: v6e:2x2x1
jax: 0.10.0
libtpu: 0.0.40
codegen_flags: <defaults>
</compile_context>

<pallas_src>
import functools

import jax
import jax.numpy as jnp
from jax.experimental import pallas as pl
from jax.experimental.pallas import tpu as pltpu


def _sum_over_channels(x, C):
    """Sum over the leading (channel / sublane) axis of a (C, TILE_HW) array."""
    if C <= 8:
        # Tiny static C: unrolled VPU adds of sublane slices (avoids XLU path).
        acc = x[0:1, :]
        for c in range(1, C):
            acc = acc + x[c:c + 1, :]
        return acc
    return jnp.sum(x, axis=0, keepdims=True)


def _layernorm2d_kernel(x_ref, w_ref, b_ref, o_ref, *, eps, C):
    # x_ref: (1, C, TILE_HW) block; w_ref / b_ref: (C, 1) per-channel affine.
    x = x_ref[0].astype(jnp.float32)                      # (C, TILE_HW)

    inv_c = 1.0 / C
    mean = _sum_over_channels(x, C) * inv_c               # (1, TILE_HW)
    xc = x - mean                                         # (C, TILE_HW)
    var = _sum_over_channels(xc * xc, C) * inv_c          # biased var (F.layer_norm)
    inv = jax.lax.rsqrt(var + eps)                        # (1, TILE_HW), EUP

    # Load + upcast affine params once; broadcast along the lane axis.
    w = w_ref[...].astype(jnp.float32)                    # (C, 1)
    b = b_ref[...].astype(jnp.float32)                    # (C, 1)

    y = (xc * inv) * w + b                                # all VPU, lane-dense
    o_ref[0] = y.astype(o_ref.dtype)


def _choose_tile_hw(HW, C, itemsize, block_budget_bytes=2 * 1024 * 1024):
    """Largest lane-dense tile along H*W that keeps one block <= budget."""
    if HW % 128 != 0:
        # Last block dim must be a multiple of 128 or the full array extent.
        return HW
    max_tile = (block_budget_bytes // (C * max(itemsize, 4))) // 128 * 128
    max_tile = max(128, max_tile)
    return min(HW, max_tile)


def layernorm2d(x_nchw, weight, bias, eps=1e-6):
    """x_nchw: (N, C, H, W). weight, bias: (C,). Returns (N, C, H, W)."""
    N, C, H, W = x_nchw.shape
    HW = H * W

    # Layout-preserving reshape (free): channels on sublanes, H*W on lanes.
    x = x_nchw.reshape(N, C, HW)
    w2 = weight.reshape(C, 1)
    b2 = bias.reshape(C, 1)

    tile_hw = _choose_tile_hw(HW, C, jnp.dtype(x_nchw.dtype).itemsize)
    grid = (N, pl.cdiv(HW, tile_hw))

    kernel = functools.partial(_layernorm2d_kernel, eps=eps, C=C)

    out = pl.pallas_call(
        kernel,
        out_shape=jax.ShapeDtypeStruct((N, C, HW), x_nchw.dtype),
        grid_spec=pltpu.PrefetchScalarGridSpec(
            num_scalar_prefetch=0,
            grid=grid,
            in_specs=[
                pl.BlockSpec((1, C, tile_hw), lambda n, j: (n, 0, j)),
                pl.BlockSpec((C, 1), lambda n, j: (0, 0)),
                pl.BlockSpec((C, 1), lambda n, j: (0, 0)),
            ],
            out_specs=pl.BlockSpec((1, C, tile_hw), lambda n, j: (n, 0, j)),
        ),
        compiler_params=pltpu.CompilerParams(
            dimension_semantics=("parallel", "parallel"),
        ),
    )(x, w2, b2)

    return out.reshape(N, C, H, W)


def layernorm2d_ref(x_nchw, weight, bias, eps=1e-6):
    x = jnp.transpose(x_nchw, (0, 2, 3, 1)).astype(jnp.float32)
    mean = jnp.mean(x, axis=-1, keepdims=True)
    var = jnp.mean((x - mean) ** 2, axis=-1, keepdims=True)
    y = (x - mean) / jnp.sqrt(var + eps)
    y = y * weight + bias
    return jnp.transpose(y, (0, 3, 1, 2)).astype(x_nchw.dtype)


if __name__ == "__main__":
    key = jax.random.PRNGKey(0)
    N, C, H, W = 2, 4, 16, 16

    kx, kw, kb = jax.random.split(key, 3)
    x = jax.random.normal(kx, (N, C, H, W), dtype=jnp.float32)
    # nn.LayerNorm defaults (weight=1, bias=0), perturbed so the affine path
    # is actually exercised.
    weight = jnp.ones((C,), jnp.float32) + 0.1 * jax.random.normal(kw, (C,), jnp.float32)
    bias = 0.1 * jax.random.normal(kb, (C,), jnp.float32)

    out = layernorm2d(x, weight, bias, eps=1e-6)
    out = jax.block_until_ready(out)

    ref = layernorm2d_ref(x, weight, bias, eps=1e-6)
    assert out.shape == (N, C, H, W)
    assert jnp.allclose(out, ref, atol=1e-5, rtol=1e-5), "mismatch vs reference"

    print("KERNEL_OK")
</pallas_src>

<mosaic_0001>
module attributes {stable_mosaic.version = 11 : i64} {
  func.func @_layernorm2d_kernel(%arg0: i32, %arg1: i32, %arg2: memref<1x4x256xf32, #tpu.memory_space<vmem>>, %arg3: memref<4x1xf32, #tpu.memory_space<vmem>>, %arg4: memref<4x1xf32, #tpu.memory_space<vmem>>, %arg5: memref<1x4x256xf32, #tpu.memory_space<vmem>>) attributes {dimension_semantics = [#tpu.dimension_semantics<parallel>, #tpu.dimension_semantics<parallel>], iteration_bounds = array<i64: 2, 1>, scalar_prefetch = 0 : i64, scratch_operands = 0 : i64, tpu.core_type = #tpu.core_type<tc>, window_params = [{transform_indices = @transform_0, window_bounds = array<i64: 1, 4, 256>}, {pipeline_mode = #tpu.pipeline_mode<synchronous>, transform_indices = @transform_1, window_bounds = array<i64: 4, 1>}, {pipeline_mode = #tpu.pipeline_mode<synchronous>, transform_indices = @transform_2, window_bounds = array<i64: 4, 1>}, {transform_indices = @transform_3, window_bounds = array<i64: 1, 4, 256>}]} {
    %c0 = arith.constant 0 : index
    %c0_0 = arith.constant 0 : index
    %c0_1 = arith.constant 0 : index
    %0 = vector.load %arg2[%c0, %c0_0, %c0_1] : memref<1x4x256xf32, #tpu.memory_space<vmem>>, vector<1x4x256xf32>
    %1 = vector.shape_cast %0 : vector<1x4x256xf32> to vector<4x256xf32>
    %2 = vector.extract_strided_slice %1 {offsets = [0, 0], sizes = [1, 256], strides = [1, 1]} : vector<4x256xf32> to vector<1x256xf32>
    %3 = vector.extract_strided_slice %1 {offsets = [1, 0], sizes = [1, 256], strides = [1, 1]} : vector<4x256xf32> to vector<1x256xf32>
    %4 = arith.addf %2, %3 : vector<1x256xf32>
    %5 = vector.extract_strided_slice %1 {offsets = [2, 0], sizes = [1, 256], strides = [1, 1]} : vector<4x256xf32> to vector<1x256xf32>
    %6 = arith.addf %4, %5 : vector<1x256xf32>
    %7 = vector.extract_strided_slice %1 {offsets = [3, 0], sizes = [1, 256], strides = [1, 1]} : vector<4x256xf32> to vector<1x256xf32>
    %8 = arith.addf %6, %7 : vector<1x256xf32>
    %cst = arith.constant 2.500000e-01 : f32
    %9 = vector.broadcast %cst : f32 to vector<1x256xf32>
    %10 = arith.mulf %8, %9 : vector<1x256xf32>
    %11 = vector.broadcast %10 : vector<1x256xf32> to vector<4x256xf32>
    %12 = arith.subf %1, %11 : vector<4x256xf32>
    %13 = arith.mulf %12, %12 : vector<4x256xf32>
    %14 = vector.extract_strided_slice %13 {offsets = [0, 0], sizes = [1, 256], strides = [1, 1]} : vector<4x256xf32> to vector<1x256xf32>
    %15 = vector.extract_strided_slice %13 {offsets = [1, 0], sizes = [1, 256], strides = [1, 1]} : vector<4x256xf32> to vector<1x256xf32>
    %16 = arith.addf %14, %15 : vector<1x256xf32>
    %17 = vector.extract_strided_slice %13 {offsets = [2, 0], sizes = [1, 256], strides = [1, 1]} : vector<4x256xf32> to vector<1x256xf32>
    %18 = arith.addf %16, %17 : vector<1x256xf32>
    %19 = vector.extract_strided_slice %13 {offsets = [3, 0], sizes = [1, 256], strides = [1, 1]} : vector<4x256xf32> to vector<1x256xf32>
    %20 = arith.addf %18, %19 : vector<1x256xf32>
    %cst_2 = arith.constant 2.500000e-01 : f32
    %21 = vector.broadcast %cst_2 : f32 to vector<1x256xf32>
    %22 = arith.mulf %20, %21 : vector<1x256xf32>
    %cst_3 = arith.constant 9.99999997E-7 : f32
    %23 = vector.broadcast %cst_3 : f32 to vector<1x256xf32>
    %24 = arith.addf %22, %23 : vector<1x256xf32>
    %25 = math.rsqrt %24 : vector<1x256xf32>
    %c0_4 = arith.constant 0 : index
    %c0_5 = arith.constant 0 : index
    %26 = vector.load %arg3[%c0_4, %c0_5] : memref<4x1xf32, #tpu.memory_space<vmem>>, vector<4x1xf32>
    %c0_6 = arith.constant 0 : index
    %c0_7 = arith.constant 0 : index
    %27 = vector.load %arg4[%c0_6, %c0_7] : memref<4x1xf32, #tpu.memory_space<vmem>>, vector<4x1xf32>
    %28 = vector.broadcast %25 : vector<1x256xf32> to vector<4x256xf32>
    %29 = arith.mulf %12, %28 : vector<4x256xf32>
    %30 = vector.broadcast %26 : vector<4x1xf32> to vector<4x256xf32>
    %31 = arith.mulf %29, %30 : vector<4x256xf32>
    %32 = vector.broadcast %27 : vector<4x1xf32> to vector<4x256xf32>
    %33 = arith.addf %31, %32 : vector<4x256xf32>
    %c0_8 = arith.constant 0 : index
    %c0_9 = arith.constant 0 : index
    %c0_10 = arith.constant 0 : index
    %34 = vector.load %arg5[%c0_8, %c0_9, %c0_10] : memref<1x4x256xf32, #tpu.memory_space<vmem>>, vector<1x4x256xf32>
    %35 = vector.shape_cast %34 : vector<1x4x256xf32> to vector<4x256xf32>
    %36 = vector.shape_cast %33 : vector<4x256xf32> to vector<1x4x256xf32>
    tpu.vector_store %arg5[%c0_8, %c0_9, %c0_10], %36 {strides = array<i32>} : memref<1x4x256xf32, #tpu.memory_space<vmem>>, vector<1x4x256xf32>,
    return
  }
  func.func @transform_0(%arg0: i32, %arg1: i32) -> (i32, i32, i32) {
    %c0_i32 = arith.constant 0 : i32
    %c0_i32_0 = arith.constant 0 : i32
    return %arg0, %c0_i32, %arg1 : i32, i32, i32
  }
  func.func @transform_1(%arg0: i32, %arg1: i32) -> (i32, i32) {
    %c0_i32 = arith.constant 0 : i32
    %c0_i32_0 = arith.constant 0 : i32
    %c0_i32_1 = arith.constant 0 : i32
    return %c0_i32, %c0_i32_0 : i32, i32
  }
  func.func @transform_2(%arg0: i32, %arg1: i32) -> (i32, i32) {
    %c0_i32 = arith.constant 0 : i32
    %c0_i32_0 = arith.constant 0 : i32
    %c0_i32_1 = arith.constant 0 : i32
    return %c0_i32, %c0_i32_0 : i32, i32
  }
  func.func @transform_3(%arg0: i32, %arg1: i32) -> (i32, i32, i32) {
    %c0_i32 = arith.constant 0 : i32
    %c0_i32_0 = arith.constant 0 : i32
    return %arg0, %c0_i32, %arg1 : i32, i32, i32
  }
}

</mosaic_0001>

<bundles_post_ra>
// kernel: tpu_custom_call.1
= control target key start
LH: loop header
LB: loop body
LE: loop exit
PB: predicated region body
PF: predicated region fallthrough
CT: control target
= control target key end

     0   :  { %8 = vsyncpa [#allocation3], 0  ;;  %s785_s0 = inlined_call_operand.hbm [shape: f32[2,4,256], index: 0, kind: input, shape index: {}]   ;;  %s786_s1 = inlined_call_operand.vmem [shape: f32[4,1], index: 1, kind: input, shape index: {}]   ;;  %s787_s2 = inlined_call_operand.vmem [shape: f32[4,1], index: 2, kind: input, shape index: {}]   ;;  %s788_s3 = inlined_call_operand.hbm [shape: f32[2,4,256], index: 3, kind: output, shape index: {}]  }
   0x1   :  { %10 = vsyncpa [#allocation3 + $0x1], 0 }
   0x2   :  { %11 = vsyncpa [#allocation4], 0 }
   0x3   :  { %13 = vsyncpa [#allocation4 + $0x1], 0  ;;  %s641_s12 = smov 0   ;;  %s643_s13 = smov 0  }
   0x4   :  { %s645_s14 = smov 0   ;;  %s647_s15 = smov 0  }
   0x5   :  { %s649_s16 = smov 0   ;;  %s651_s17 = smov 0  }
   0x6 LB: > { %s417_s18 = sadd.s32 4294967295, %s615_s17   ;;  %s418_s19 = sadd.s32 4294967294, %s615_s17   ;;  %s615_s17 = sphi %s651_s17, %s19_s17   ;;  %s611_s16 = sphi %s649_s16, %s800_s16   ;;  %s607_s15 = sphi %s647_s15, %s799_s15   ;;  %s603_s14 = sphi %s645_s14, %s798_s14   ;;  %s599_s13 = sphi %s643_s13, %s797_s13   ;;  %s595_s12 = sphi %s641_s12, %s796_s12  }
   0x7   : > { %s31_s20 = sadd.s32 1, %s611_s16  ;;  %s40_s21 = sadd.s32 1, %s603_s14 }
   0x8   : > { %p33_p0 = scmp.ge.s32.totalorder %s31_s20, 2  ;;  %p47_p1 = scmp.ne.s32.totalorder %s603_s14, %s599_s13 }
   0x9   : > { %p48_p2 = scmp.eq.s32.totalorder %s615_s17, 0  ;;  %p53_p3 = scmp.ne.s32.totalorder %s599_s13, %s595_s12 }
   0xa   : > { %s802_s20 = smov (%p33_p0, %s31_s20), 0  ;;  %p54_p5 = scmp.eq.s32.totalorder %s417_s18, 0 }
   0xb   : > { %p682_p4 = por %p48_p2, %p47_p1  ;;  %s35_s23 = ssub.s32 %s611_s16, %s802_s20 }
   0xc   : > { %p121_p6 = scmp.eq.s32.totalorder %s417_s18, 1  ;;  %p38_p7 = scmp.eq.s32.totalorder %s35_s23, 0 }
   0xd   : > { %p688_p8 = por %p54_p5, %p53_p3  ;;  %p127_p10 = scmp.eq.s32.totalorder %s418_s19, 1 }
   0xe   : > { %p692_p9 = por %p121_p6, %p47_p1  ;;  %p452_p13 = scmp.lt.s32.totalorder %s615_s17, 2 }
   0xf   : > { %s697_s26 = scalar_select %p38_p7, %s603_s14, %s40_s21  }
  0x10   : > { %p699_p11 = por %p127_p10, %p53_p3  ;;  %s153_s28 = sand.u32 1, %s603_s14  }
  0x11   : > { %s421_s29 = sshll.u32 %s153_s28, 3  ;;  %s438_s30 = sshll.u32 %s611_s16, 7 }
  0x12   : > { %s792_s27 = scalar_select %p699_p11, 1, 0 }
  0x13   : > { %s165_s6 = scalar_lea.hbm %s785_s0, %s438_s30  ;;  %s157_s7 = scalar_lea.vmem [#allocation2], %s421_s29 }
  0x14   : > { %s167_s8 = sshll.u32 %s157_s7, 4  ;;  %p712_p0 = pnand %p452_p13, %p682_p4  ;;  %s168_s8 = int_to_ptr.vmem [resolvable:$true] %s167_s8 }
  0x15   : > { %p424_p1 = scmp.ge.s32.totalorder %s615_s17, 1  ;;  %p172_p2 = scmp.lt.s32.totalorder %s615_s17, 3 }
  0x16   : > { %s154_s10 = scalar_lea.sflag [#allocation3], %s153_s28  ;;  %p509_p3 = pneg %p712_p0 }
  0x17   : > { %s520_s11 = scalar_lea.vmem %s168_s8, 128  ;;  %s617_s18 = smov [#allocation2]  }
  0x18   : > { %p521_p5 = scmp.ne.s32.totalorder %s168_s8, %s520_s11  ;;  %s525_s19 = sshll.u32 %s617_s18, 4  ;;  %s526_s19 = int_to_ptr.vmem [resolvable:$false] %s525_s19 }
  0x19   : > { %s527_s21 = scalar_lea.vmem %s526_s19, 256  ;;  %p528_p10 = scmp.lt.s32.totalorder %s168_s8, %s526_s19 }
  0x1a   : > { %p523_p6 = pnand %p521_p5, %p509_p3  ;;  %p529_p12 = scmp.lt.s32.totalorder %s527_s21, %s520_s11 }
  0x1c   : > { %p524_p7 = pneg %p523_p6  ;;  %p530_p4 = por %p529_p12, %p528_p10 }
  0x1e   : > { %p531_p13 = pnand %p530_p4, %p524_p7 }
  0x20   : > { %534 = shalt.err (!%p531_p13)
}
  0x21   : > { %447 = dma.hbm_to_vmem [thread:$0]  (!%p712_p0), %s165_s6, 128, %s168_s8, %s154_s10  }
  0x22   : > { %p173_p11 = pnand %p424_p1, %p172_p2 }
  0x23   : > { %s727_s22 = sand.u32 (!%p173_p11), 1, %s599_s13  }
  0x24   : > { %176 = sbr.rel (%p173_p11) target bundleno = 189 (0xbd), region = 32  ;;  %s425_s23 = sshll.u32 (!%p173_p11), %s727_s22, 3 }
  0x25   : > { %s179_s28 = scalar_lea.sflag (!%p173_p11), [#allocation3], %s727_s22  ;;  %s182_s29 = scalar_lea.vmem (!%p173_p11), [#allocation2], %s425_s23 }
  0x29   : > { %586 = dma.done.wait (%p688_p8), %s179_s28, 128  }
  0x2a   : > { %588 = vsyncadd (%p688_p8), %s179_s28, 4294967168  ;;  %v618_v0 = vmov 0   ;;  %v263_v1 = vld [vmem:[%s786_s1] sm:$0xf]  ;;  %v223_v7 = vlaneseq  ;;  %v619_v31 = vmov 839922192  }
  0x2b   : > { %504 = vset.pattern.permute.xlu0 %v618_v0  ;;  %v264_v2 = vld [vmem:[%s787_s2] sm:$0xf]  ;;  %v294_v32 = vunpack.c.l.s4 %v619_v31  ;;  %s439_s24 = sshll.u32 %s607_s15, 7  ;;  %s204_s7 = scalar_lea.vmem [#allocation5], %s425_s23 }
  0x2c   : > { %291 = vperm.xlu0 %504, %v263_v1   ;;  %v207_v3 = vld [vmem:[%s182_s29] sm:$0xff]  ;;  %v224_v10 = vshrl.u32 %v223_v7, 7  ;;  %s333_s8 = sshll.u32 %s204_s7, 4  ;;  %s331_s11 = scalar_lea.hbm %s788_s3, %s439_s24  ;;  %s334_s8 = int_to_ptr.vmem [resolvable:$true] %s333_s8 }
  0x2d   : > { %v427_v4 = vrot.slane %v207_v3, 9  ;;  %v428_v6 = vrot.slane %v207_v3, 10  ;;  %v429_v9 = vrot.slane %v207_v3, 11  ;;  %v295_v35 = vunpack.c.0.s8 %v294_v32  ;;  %s317_s18 = scalar_lea.sflag [#allocation4], %s727_s22  ;;  %s535_s19 = scalar_lea.vmem %s334_s8, 128 }
  0x2e   : > { %v225_v12 = vsub.s32 0, %v224_v10  ;;  %v229_v13 = vsub.s32 4, %v224_v10  ;;  %p536_p8 = scmp.ne.s32.totalorder %s334_s8, %s535_s19  ;;  %s620_s21 = smov [#allocation5]  }
  0x2f   : > { %v212_v5 = vadd.f32 %v427_v4, %v207_v3  ;;  %v298_v38 = vsub.s32 %v295_v35, %v224_v10  ;;  %s539_s15 = sshll.u32 %s620_s21, 4  ;;  %s540_s15 = int_to_ptr.vmem [resolvable:$false] %s539_s15 }
  0x30   : > { %304 = vperm.xlu0 %504, %v264_v2   ;;  %p537_p11 = pnand %p536_p8, %p692_p9  ;;  %s541_s23 = scalar_lea.vmem %s540_s15, 256 }
  0x31   : > { %v216_v8 = vadd.f32 %v428_v6, %v212_v5  ;;  %p542_p0 = scmp.lt.s32.totalorder %s334_s8, %s540_s15  ;;  %p543_p1 = scmp.lt.s32.totalorder %s541_s23, %s535_s19 }
  0x32   : > { %p538_p12 = pneg %p537_p11 }
  0x33   : > { %v220_v11 = vadd.f32 %v429_v9, %v216_v8  ;;  %p544_p2 = por %p543_p1, %p542_p0 }
  0x35   : > { %v221_v14 = vmul.f32 0.25, %v220_v11  ;;  %p545_p3 = pnand %p544_p2, %p538_p12 }
  0x37   : > { %v226_v15 = vrot.slane %v221_v14, %v225_v12  ;;  %v230_v16 = vrot.slane %v221_v14, %v229_v13 }
  0x39   : > { %v236_v17 = vrot.slane %v226_v15, %v225_v12  ;;  %v240_v18 = vrot.slane %v230_v16, %v225_v12 }
  0x3b   : > { %v243_v19 = vcombine.low %v236_v17, %v240_v18 }
  0x3d   : > { %v245_v20 = vsub.f32 %v207_v3, %v243_v19 }
  0x3f   : > { %v246_v21 = vmul.f32 %v245_v20, %v245_v20 }
  0x41   : > { %v430_v22 = vrot.slane %v246_v21, 9  ;;  %v431_v24 = vrot.slane %v246_v21, 10  ;;  %v432_v26 = vrot.slane %v246_v21, 11 }
  0x43   : > { %v251_v23 = vadd.f32 %v430_v22, %v246_v21 }
  0x45   : > { %v255_v25 = vadd.f32 %v431_v24, %v251_v23 }
  0x47   : > { %v259_v27 = vadd.f32 %v432_v26, %v255_v25 }
  0x49   : > { %v260_v28 = vmul.f32 0.25, %v259_v27 }
  0x4b   : > { %v261_v29 = vadd.f32 1e-06, %v260_v28 }
  0x4d   : > { %505 = vrsqrt.f32 %v261_v29 }
  0x5a   : > { %v506_v30 = vpop.eup %505 }
  0x5b   : > { %v269_v33 = vrot.slane %v506_v30, %v225_v12  ;;  %v273_v34 = vrot.slane %v506_v30, %v229_v13 }
  0x5d   : > { %v279_v36 = vrot.slane %v269_v33, %v225_v12  ;;  %v283_v37 = vrot.slane %v273_v34, %v225_v12 }
  0x5f   : > { %v286_v39 = vcombine.low %v279_v36, %v283_v37 }
  0x61   : > { %v288_v41 = vmul.f32 %v286_v39, %v245_v20 }
  0xa7   : > { %v292_v40 = vpop.permute.xlu0 %291 }
  0xa8   : > { %v299_v42 = vrot.slane %v292_v40, %v298_v38 }
  0xaa   : > { %v301_v44 = vmul.f32 %v299_v42, %v288_v41 }
  0xab   : > { %v305_v43 = vpop.permute.xlu0 %304 }
  0xac   : > { %v312_v45 = vrot.slane %v305_v43, %v298_v38 }
  0xae   : > { %v314_v46 = vadd.f32 %v312_v45, %v301_v44 }
  0xb0   : > { %315 = vst [vmem:[%s204_s7] sm:$0xff] %v314_v46 }
  0xb1   : > { %548 = shalt.err (!%p545_p3)
}
  0xb2   : > { %s549_s28 = scalar_lea.hbm %s331_s11, 128  ;;  %s553_s30 = scalar_lea.hbm %s788_s3, 256 }
  0xb3   : > { %p550_p5 = scmp.ne.s32.totalorder %s331_s11, %s549_s28  ;;  %p554_p10 = scmp.lt.s32.totalorder %s331_s11, %s788_s3 }
  0xb4   : > { %p555_p4 = scmp.lt.s32.totalorder %s553_s30, %s549_s28 }
  0xb5   : > { %p551_p6 = pnand %p550_p5, %p692_p9 }
  0xb6   : > { %p556_p13 = por %p555_p4, %p554_p10 }
  0xb7   : > { %p552_p7 = pneg %p551_p6 }
  0xb9   : > { %p557_p8 = pnand %p556_p13, %p552_p7 }
  0xbb   : > { %560 = shalt.err (!%p557_p8)
}
  0xbc   : > { %442 = dma.vmem_to_hbm [thread:$0]  (%p692_p9), %s334_s8, 128, %s331_s11, %s317_s18  }
  0xbd PF: > { %s345_s6 = sand.u32 1, %s595_s12   ;;  %p794_p11 = scmp.ne.s32.totalorder %s792_s27, 0 }
  0xbe   : > { %p795_p12 = scmp.ge.s32.totalorder %s615_s17, 2  ;;  %s346_s24 = scalar_lea.sflag [#allocation4], %s345_s6 }
  0xc0   : > { %p449_p0 = pnand %p795_p12, %p794_p11 }
  0xc2   : > { %p450_p1 = pneg %p449_p0 }
  0xc4   : > { %590 = dma.done.wait (%p450_p1), %s346_s24, 128  }
  0xc5   : > { %592 = vsyncadd (%p450_p1), %s346_s24, 4294967168  ;;  %s19_s17 = sadd.s32 1, %s615_s17   ;;  %s796_s12 = smov %s599_s13 }
  0xc6   : > { %p16_p2 = scmp.ge.s32.totalorder %s19_s17, 4   ;;  %s797_s13 = smov %s603_s14 }
  0xc7   : > { %s798_s14 = smov %s697_s26  ;;  %s799_s15 = smov %s611_s16 }
  0xc8   : > { %s800_s16 = smov %s802_s20  ;;  %18 = sbr.rel (!%p16_p2) target bundleno = 6 (0x6), region = 77 }
  0xcd   :  { %351 = vsyncpa [#allocation3], 1 }
  0xce   :  { %353 = vsyncpa [#allocation3 + $0x1], 1 }
  0xcf   :  { %354 = vsyncpa [#allocation4], 1 }
  0xd0   :  { %356 = vsyncpa [#allocation4 + $0x1], 1 }

</bundles_post_ra>
